<compile_context>
chip_gen: v5e
topology: v5e:2x2
jax: 0.10.0
libtpu: 0.0.40
codegen_flags: <defaults>
</compile_context>

<pallas_src>
import functools
from typing import NamedTuple, Optional

import jax
import jax.numpy as jnp
from jax.experimental import pallas as pl
from jax.experimental.pallas import tpu as pltpu


# ---------------------------------------------------------------------------
# Helpers
# ---------------------------------------------------------------------------
def _round_up(x, m):
    return ((x + m - 1) // m) * m


def _cdiv(a, b):
    return (a + b - 1) // b


_FALLBACK_VMEM_BUDGET = 28 * 1024 * 1024
_VMEM_BUDGET_CACHE = [None]


def _vmem_budget():
    """Generation-aware VMEM working-set budget (bytes)."""
    if _VMEM_BUDGET_CACHE[0] is None:
        cap = 0
        try:
            cap = int(getattr(pltpu.get_tpu_info(), "vmem_capacity_bytes", 0))
        except Exception:
            cap = 0
        if cap <= 0:
            # Unknown hardware: stay safe for every generation (incl. v7x 64 MiB).
            _VMEM_BUDGET_CACHE[0] = _FALLBACK_VMEM_BUDGET
        else:
            # ~75% of physical VMEM: ~96 MiB on v5e/v6e, ~48 MiB on v7x.
            _VMEM_BUDGET_CACHE[0] = (cap * 3) // 4
    return _VMEM_BUDGET_CACHE[0]


def _pick_tile(dim, cap, mult):
    """Padding-aware tile: mult-aligned, <= cap, balanced across cdiv(dim,cap) tiles."""
    cap = max(mult, (cap // mult) * mult)
    if dim <= cap:
        return _round_up(max(dim, 1), mult)
    n_tiles = _cdiv(dim, cap)
    return min(cap, _round_up(_cdiv(dim, n_tiles), mult))


# ---------------------------------------------------------------------------
# Kernels
# ---------------------------------------------------------------------------
def _full_k_kernel_bias(x_ref, w_ref, b_ref, o_ref):
    x = x_ref[...]
    if x.dtype != w_ref.dtype:           # VPU cast, free under an MXU-bound kernel
        x = x.astype(w_ref.dtype)
    acc = jnp.dot(x, w_ref[...], preferred_element_type=jnp.float32)
    o_ref[...] = (acc + b_ref[...]).astype(o_ref.dtype)


def _full_k_kernel_nobias(x_ref, w_ref, o_ref):
    x = x_ref[...]
    if x.dtype != w_ref.dtype:
        x = x.astype(w_ref.dtype)
    o_ref[...] = jnp.dot(x, w_ref[...],
                         preferred_element_type=jnp.float32).astype(o_ref.dtype)


def _k_split_kernel_bias(x_ref, w_ref, b_ref, o_ref, acc_ref):
    k = pl.program_id(2)

    @pl.when(k == 0)
    def _():
        acc_ref[...] = jnp.zeros_like(acc_ref)

    x = x_ref[...]
    if x.dtype != w_ref.dtype:
        x = x.astype(w_ref.dtype)
    acc_ref[...] += jnp.dot(x, w_ref[...], preferred_element_type=jnp.float32)

    @pl.when(k == pl.num_programs(2) - 1)
    def _():
        o_ref[...] = (acc_ref[...] + b_ref[...]).astype(o_ref.dtype)


def _k_split_kernel_nobias(x_ref, w_ref, o_ref, acc_ref):
    k = pl.program_id(2)

    @pl.when(k == 0)
    def _():
        acc_ref[...] = jnp.zeros_like(acc_ref)

    x = x_ref[...]
    if x.dtype != w_ref.dtype:
        x = x.astype(w_ref.dtype)
    acc_ref[...] += jnp.dot(x, w_ref[...], preferred_element_type=jnp.float32)

    @pl.when(k == pl.num_programs(2) - 1)
    def _():
        o_ref[...] = acc_ref[...].astype(o_ref.dtype)


# ---------------------------------------------------------------------------
# Prepack (mirrors torch.ops.ipex_prepack.linear_prepack — done ONCE)
# ---------------------------------------------------------------------------
class PackedLinear(NamedTuple):
    weight: jax.Array              # (Kp, Np) compute dtype, zero-padded == weight.T
    bias: Optional[jax.Array]      # (1, Np) float32, zero-padded, or None
    in_features: int               # K
    out_features: int              # N
    tn: int                        # N tile chosen at prepack time


def linear_prepack(weight, bias=None, compute_dtype=jnp.bfloat16):
    """Cast/transpose/pad the weight once so per-call work touches only x."""
    N, K = weight.shape            # torch Linear weight is (out_features, in_features)
    budget = _vmem_budget()
    big = budget >= (60 << 20)
    cap_n = 1024 if big else 512   # lane-dense output tiles; bigger on 128 MiB parts
    tn = _pick_tile(N, cap_n, 128)
    Np = _round_up(N, tn)
    Kp = _round_up(K, 128)

    wt = jnp.asarray(weight).T     # (K, N) — natural MXU layout
    if wt.dtype != compute_dtype:
        wt = wt.astype(compute_dtype)
    if (Kp, Np) != (K, N):
        wt = jnp.pad(wt, ((0, Kp - K), (0, Np - N)))

    b = None
    if bias is not None:
        b = jnp.asarray(bias).reshape(1, N).astype(jnp.float32)
        if Np != N:
            b = jnp.pad(b, ((0, 0), (0, Np - N)))

    return PackedLinear(weight=wt, bias=b, in_features=K, out_features=N, tn=tn)


# ---------------------------------------------------------------------------
# Forward
# ---------------------------------------------------------------------------
@functools.partial(jax.jit,
                   static_argnames=("n_out", "k_in", "tn", "force_k_split"))
def _linear_fwd(x, w_packed, b_packed, *, n_out, k_in, tn, force_k_split=False):
    K, N = k_in, n_out
    Kp, Np = w_packed.shape
    has_bias = b_packed is not None
    compute_dtype = w_packed.dtype
    cb = jnp.dtype(compute_dtype).itemsize
    out_dtype = x.dtype
    ob = jnp.dtype(out_dtype).itemsize
    orig_shape = x.shape

    # batch_size_collapsed: collapse leading batch dims into M.
    x2d = x.reshape(-1, K)
    M = x2d.shape[0]
    xb_in = jnp.dtype(x2d.dtype).itemsize

    budget = _vmem_budget()
    big = budget >= (60 << 20)
    cap_m = 512 if big else 256
    mult_m = 8 if M <= 8 else 16
    tm = _pick_tile(M, cap_m, mult_m)
    Mp = _round_up(M, tm)
    nj = Np // tn
    ni = Mp // tm

    # Keep >=2 'parallel' grid iterations so both v7x TensorCores get work.
    if ni * nj == 1 and M > 8:
        tm = _round_up(_cdiv(M, 2), 8)
        Mp = _round_up(M, tm)
        ni = Mp // tm

    needs_cast = x2d.dtype != compute_dtype
    x_is_wide = needs_cast and xb_in > cb

    bias_ws = (2 * tn * 4) if has_bias else 0
    out_ws = 2 * tm * tn * ob

    # Full-K loop order: keep resident the operand that would otherwise be
    # redundantly re-read from HBM.
    redundant_w_res = (nj - 1) * Mp * Kp     # extra x reads if weight is resident
    redundant_x_res = (ni - 1) * Np * Kp     # extra w reads if x is resident
    w_resident = redundant_w_res <= redundant_x_res
    inner_iters = ni if w_resident else nj
    x_reload = nj if w_resident else 1

    def ws_full(res_bufs, xbytes):
        if w_resident:
            return (res_bufs * Kp * tn * cb + 2 * tm * Kp * xbytes
                    + out_ws + bias_ws)
        return (res_bufs * tm * Kp * xbytes + 2 * Kp * tn * cb
                + out_ws + bias_ws)

    # Candidate full-K configs, most preferred first:
    #   (resident-operand buffer count, bytes/elem of x held in VMEM)
    cands = []
    if x_is_wide and x_reload == 1:
        cands.append((2, xb_in))             # skip wrapper astype, cast in-kernel
    cands.append((2, cb))
    if inner_iters >= 2:                     # single-buffer the resident panel
        if x_is_wide and x_reload == 1:
            cands.append((1, xb_in))
        cands.append((1, cb))

    full_cfg = None
    if not force_k_split:
        for res_bufs, xbytes in cands:
            if ws_full(res_bufs, xbytes) <= budget:
                full_cfg = (res_bufs, xbytes)
                break

    if full_cfg is not None:
        cast_in_wrapper = needs_cast and full_cfg[1] == cb
    else:
        cast_in_wrapper = needs_cast         # K-split streams x -> cast once up front

    if cast_in_wrapper:
        x2d = x2d.astype(compute_dtype)
    if (Mp, Kp) != (M, K):                   # per-call x padding (ragged M / K)
        x2d = jnp.pad(x2d, ((0, Mp - M), (0, Kp - K)))
    x_bytes_elem = jnp.dtype(x2d.dtype).itemsize

    cost = pl.CostEstimate(
        flops=2 * Mp * Np * Kp,
        transcendentals=0,
        bytes_accessed=(Mp * Kp * x_bytes_elem + Kp * Np * cb + Mp * Np * ob
                        + (Np * 4 if has_bias else 0)),
    )

    if full_cfg is not None:
        res_bufs, _ = full_cfg
        buffered = pl.Buffered(res_bufs) if res_bufs != 2 else None
        if w_resident:
            # N panels outer, M tiles inner: each (Kp, tn) weight panel is DMA'd once.
            grid = (nj, ni)
            x_spec = pl.BlockSpec((tm, Kp), lambda j, i: (i, 0))
            if buffered is None:
                w_spec = pl.BlockSpec((Kp, tn), lambda j, i: (0, j))
            else:
                w_spec = pl.BlockSpec((Kp, tn), lambda j, i: (0, j),
                                      pipeline_mode=buffered)
            o_spec = pl.BlockSpec((tm, tn), lambda j, i: (i, j))
            b_spec = pl.BlockSpec((1, tn), lambda j, i: (0, j))
        else:
            # M tiles outer, N panels inner: each (tm, Kp) x panel is DMA'd once.
            grid = (ni, nj)
            if buffered is None:
                x_spec = pl.BlockSpec((tm, Kp), lambda i, j: (i, 0))
            else:
                x_spec = pl.BlockSpec((tm, Kp), lambda i, j: (i, 0),
                                      pipeline_mode=buffered)
            w_spec = pl.BlockSpec((Kp, tn), lambda i, j: (0, j))
            o_spec = pl.BlockSpec((tm, tn), lambda i, j: (i, j))
            b_spec = pl.BlockSpec((1, tn), lambda i, j: (0, j))
        kernel = _full_k_kernel_bias if has_bias else _full_k_kernel_nobias
        scratch = []
        semantics = ("parallel", "parallel")
        ws = ws_full(*full_cfg)
    else:
        # K-split fallback: f32 VMEM accumulator, reduction axis last.
        def ws_split(tk_):
            return (2 * tm * tk_ * x_bytes_elem + 2 * tk_ * tn * cb
                    + out_ws + bias_ws + tm * tn * 4)

        if force_k_split:
            tk = 128                       # testing hook: exercise accumulation
        else:
            tk, t = 128, 128               # largest 128-multiple dividing Kp that fits
            while t <= Kp:
                if Kp % t == 0 and ws_split(t) <= budget:
                    tk = t
                t += 128
        grid = (ni, nj, Kp // tk)
        x_spec = pl.BlockSpec((tm, tk), lambda i, j, k: (i, k))
        w_spec = pl.BlockSpec((tk, tn), lambda i, j, k: (k, j))
        o_spec = pl.BlockSpec((tm, tn), lambda i, j, k: (i, j))
        b_spec = pl.BlockSpec((1, tn), lambda i, j, k: (0, j))
        kernel = _k_split_kernel_bias if has_bias else _k_split_kernel_nobias
        scratch = [pltpu.VMEM((tm, tn), jnp.float32)]
        semantics = ("parallel", "parallel", "arbitrary")
        ws = ws_split(tk)

    in_specs = [x_spec, w_spec] + ([b_spec] if has_bias else [])
    args = (x2d, w_packed) + ((b_packed,) if has_bias else ())
    vmem_limit = int(max(32 << 20, min(ws + (8 << 20), budget + (8 << 20))))

    out = pl.pallas_call(
        kernel,
        out_shape=jax.ShapeDtypeStruct((Mp, Np), out_dtype),
        grid_spec=pltpu.PrefetchScalarGridSpec(
            num_scalar_prefetch=0,
            grid=grid,
            in_specs=in_specs,
            out_specs=o_spec,
            scratch_shapes=scratch,
        ),
        compiler_params=pltpu.CompilerParams(
            dimension_semantics=semantics,
            vmem_limit_bytes=vmem_limit,
        ),
        cost_estimate=cost,
    )(*args)

    out = out[:M, :N]
    return out.reshape(*orig_shape[:-1], N)


def ipex_linear(x, packed: PackedLinear, *, force_k_split=False):
    """y = x @ weight.T + bias (torch.ops.torch_ipex.ipex_linear forward)."""
    assert x.shape[-1] == packed.in_features
    return _linear_fwd(x, packed.weight, packed.bias,
                       n_out=packed.out_features, k_in=packed.in_features,
                       tn=packed.tn, force_k_split=force_k_split)


class IPEXLinear:
    """Pallas-TPU mirror of intel_extension_for_pytorch _IPEXLinear (forward only)."""

    def __init__(self, weight, bias=None, compute_dtype=jnp.bfloat16):
        # weight: (out_features, in_features) like torch.nn.Linear.
        self.ctx = linear_prepack(weight, bias, compute_dtype)   # one-time prepack
        self.weight = self.ctx.weight     # analogous to ctx.get_weight()
        self.bias = self.ctx.bias

    def __call__(self, x):
        return ipex_linear(x, self.ctx)

    forward = __call__


# TODO(synk): the IPEX prepack ctx blocked-oneDNN layout (ctx.pack / ctx.to_public),
# the master_weight / weight_trail bf16-split helpers (cat_bfloat16_float) and
# _save_to/_load_from_state_dict are layout/serialization-only — no math to port.

if __name__ == "__main__":
    batch, seq = 2, 8
    in_features, out_features = 256, 128

    key = jax.random.PRNGKey(0)
    kx, kw, kb = jax.random.split(key, 3)

    x = jax.random.normal(kx, (batch, seq, in_features), dtype=jnp.float32)
    weight = jax.random.normal(kw, (out_features, in_features), dtype=jnp.float32) * 0.02
    bias = jax.random.normal(kb, (out_features,), dtype=jnp.float32) * 0.01

    # Reference with the same bf16 operand rounding the kernel uses (f32 accumulate).
    xb = x.astype(jnp.bfloat16).astype(jnp.float32)
    wb = weight.astype(jnp.bfloat16).astype(jnp.float32)
    y_ref = xb @ wb.T + bias

    # 1) Module-style use: prepack once, fused-bias full-K path.
    layer = IPEXLinear(weight, bias)
    y = layer(x)
    jax.block_until_ready(y)
    assert y.shape == (batch, seq, out_features)
    assert jnp.allclose(y, y_ref, atol=1e-4, rtol=1e-4)
    # Sanity vs full-f32 reference (loose tolerance covers bf16 input rounding).
    assert jnp.allclose(y, x @ weight.T + bias, atol=3e-2, rtol=3e-2)

    # 2) No-bias variant (separate kernel, no zero-bias DMA).
    y_nb = IPEXLinear(weight, None)(x)
    jax.block_until_ready(y_nb)
    assert jnp.allclose(y_nb, xb @ wb.T, atol=1e-4, rtol=1e-4)

    # 3) Forced K-split path (exercises the f32 accumulator kernel).
    y_ks = ipex_linear(x, layer.ctx, force_k_split=True)
    jax.block_until_ready(y_ks)
    assert jnp.allclose(y_ks, y_ref, atol=1e-4, rtol=1e-4)

    # 4) Ragged shapes exercise padding-aware tiles + output slicing.
    kx2, kw2, kb2 = jax.random.split(jax.random.PRNGKey(1), 3)
    x2 = jax.random.normal(kx2, (3, 5, 200), dtype=jnp.float32)
    w2 = jax.random.normal(kw2, (100, 200), dtype=jnp.float32) * 0.02
    b2 = jax.random.normal(kb2, (100,), dtype=jnp.float32) * 0.01
    y2 = IPEXLinear(w2, b2)(x2)
    jax.block_until_ready(y2)
    y2_ref = (x2.astype(jnp.bfloat16).astype(jnp.float32)
              @ w2.astype(jnp.bfloat16).astype(jnp.float32).T + b2)
    assert y2.shape == (3, 5, 100)
    assert jnp.allclose(y2, y2_ref, atol=1e-4, rtol=1e-4)

    # 5) Wide output / many N panels: exercises the x-resident loop order
    #    and the in-kernel f32 -> bf16 cast of x.
    kx3, kw3 = jax.random.split(jax.random.PRNGKey(2), 2)
    x3 = jax.random.normal(kx3, (2, 64, 128), dtype=jnp.float32)
    w3 = jax.random.normal(kw3, (2048, 128), dtype=jnp.float32) * 0.02
    y3 = IPEXLinear(w3, None)(x3)
    jax.block_until_ready(y3)
    y3_ref = (x3.astype(jnp.bfloat16).astype(jnp.float32)
              @ w3.astype(jnp.bfloat16).astype(jnp.float32).T)
    assert y3.shape == (2, 64, 2048)
    assert jnp.allclose(y3, y3_ref, atol=1e-4, rtol=1e-4)

    print("KERNEL_OK")
</pallas_src>

<mosaic_0001>
module attributes {stable_mosaic.version = 11 : i64} {
  func.func @_full_k_kernel_bias(%arg0: i32, %arg1: i32, %arg2: memref<8x256xf32, #tpu.memory_space<vmem>>, %arg3: memref<256x128xbf16, #tpu.memory_space<vmem>>, %arg4: memref<1x128xf32, #tpu.memory_space<vmem>>, %arg5: memref<8x128xf32, #tpu.memory_space<vmem>>) attributes {dimension_semantics = [#tpu.dimension_semantics<parallel>, #tpu.dimension_semantics<parallel>], iteration_bounds = array<i64: 1, 2>, scalar_prefetch = 0 : i64, scratch_operands = 0 : i64, tpu.core_type = #tpu.core_type<tc>, window_params = [{transform_indices = @transform_0, window_bounds = array<i64: 8, 256>}, {transform_indices = @transform_1, window_bounds = array<i64: 256, 128>}, {transform_indices = @transform_2, window_bounds = array<i64: 1, 128>}, {transform_indices = @transform_3, window_bounds = array<i64: 8, 128>}]} {
    %c0 = arith.constant 0 : index
    %c0_0 = arith.constant 0 : index
    %0 = vector.load %arg2[%c0, %c0_0] : memref<8x256xf32, #tpu.memory_space<vmem>>, vector<8x256xf32>
    %1 = arith.truncf %0 : vector<8x256xf32> to vector<8x256xbf16>
    %c0_1 = arith.constant 0 : index
    %c0_2 = arith.constant 0 : index
    %2 = vector.load %arg3[%c0_1, %c0_2] : memref<256x128xbf16, #tpu.memory_space<vmem>>, vector<256x128xbf16>
    %cst = arith.constant dense<0.000000e+00> : vector<8x128xf32>
    %3 = tpu.matmul %1, %2, %cst {dimension_numbers = #tpu.dot_dimension_numbers<[1], [0], [0], [1], [0, 0, 1, 1], [], []>} : vector<8x256xbf16>, vector<256x128xbf16>, vector<8x128xf32> -> vector<8x128xf32>
    %c0_3 = arith.constant 0 : index
    %c0_4 = arith.constant 0 : index
    %4 = vector.load %arg4[%c0_3, %c0_4] : memref<1x128xf32, #tpu.memory_space<vmem>>, vector<1x128xf32>
    %5 = vector.broadcast %4 : vector<1x128xf32> to vector<8x128xf32>
    %6 = arith.addf %3, %5 : vector<8x128xf32>
    %c0_5 = arith.constant 0 : index
    %c0_6 = arith.constant 0 : index
    %7 = vector.load %arg5[%c0_5, %c0_6] : memref<8x128xf32, #tpu.memory_space<vmem>>, vector<8x128xf32>
    tpu.vector_store %arg5[%c0_5, %c0_6], %6 {strides = array<i32>} : memref<8x128xf32, #tpu.memory_space<vmem>>, vector<8x128xf32>,
    return
  }
  func.func @transform_0(%arg0: i32, %arg1: i32) -> (i32, i32) {
    %c0_i32 = arith.constant 0 : i32
    %c0_i32_0 = arith.constant 0 : i32
    return %arg1, %c0_i32 : i32, i32
  }
  func.func @transform_1(%arg0: i32, %arg1: i32) -> (i32, i32) {
    %c0_i32 = arith.constant 0 : i32
    %c0_i32_0 = arith.constant 0 : i32
    return %c0_i32, %arg0 : i32, i32
  }
  func.func @transform_2(%arg0: i32, %arg1: i32) -> (i32, i32) {
    %c0_i32 = arith.constant 0 : i32
    %c0_i32_0 = arith.constant 0 : i32
    return %c0_i32, %arg0 : i32, i32
  }
  func.func @transform_3(%arg0: i32, %arg1: i32) -> (i32, i32) {
    %c0_i32 = arith.constant 0 : i32
    return %arg1, %arg0 : i32, i32
  }
}

</mosaic_0001>

<bundles_post_ra>
// kernel: _linear_fwd.1
= control target key start
LH: loop header
LB: loop body
LE: loop exit
PB: predicated region body
PF: predicated region fallthrough
CT: control target
= control target key end

     0   :  { %8 = vsyncpa [#allocation3], 0  ;;  %s1020_s0 = inlined_call_operand.hbm [shape: f32[16,256], index: 0, kind: input, shape index: {}]   ;;  %s1021_s1 = inlined_call_operand.hbm [shape: bf16[256,128], index: 1, kind: input, shape index: {}]   ;;  %s1022_s2 = inlined_call_operand.vmem [shape: f32[1,128], index: 2, kind: input, shape index: {}]   ;;  %s1023_s3 = inlined_call_operand.hbm [shape: f32[16,128], index: 3, kind: output, shape index: {}]  }
   0x1   :  { %10 = vsyncpa [#allocation3 + $0x1], 0 }
   0x2   :  { %11 = vsyncpa [#allocation6], 0 }
   0x3   :  { %12 = vsyncpa [#allocation4], 0 }
   0x4   :  { %14 = vsyncpa [#allocation4 + $0x1], 0  ;;  %s869_s12 = smov 0   ;;  %s871_s13 = smov 0  }
   0x5   :  { %s873_s14 = smov 0   ;;  %s875_s15 = smov 0  }
   0x6   :  { %s877_s16 = smov 0   ;;  %s879_s17 = smov 0  }
   0x7 LB: > { %s524_s18 = sadd.s32 4294967295, %s844_s17   ;;  %p526_p0 = scmp.ge.s32.totalorder %s844_s17, 1  ;;  %s844_s17 = sphi %s879_s17, %s20_s17   ;;  %s840_s16 = sphi %s877_s16, %s1034_s16   ;;  %s836_s15 = sphi %s875_s15, %s1033_s15   ;;  %s832_s14 = sphi %s873_s14, %s1032_s14   ;;  %s828_s13 = sphi %s871_s13, %s1031_s13   ;;  %s824_s12 = sphi %s869_s12, %s1030_s12  }
   0x8   : > { %p901_p1 = scmp.eq.s32.totalorder %s524_s18, 0  ;;  %p143_p2 = scmp.lt.s32.totalorder %s844_s17, 3 }
   0x9   : > { %s156_s22 = sshll.u32 %s1021_s1, 4  ;;  %s846_s24 = smov [#allocation5]   ;;  %s157_s22 = int_to_ptr.hbm [resolvable:$true] %s156_s22 }
   0xa   : > { %p909_p3 = pnand %p526_p0, %p143_p2  ;;  %s158_s25 = sshll.u32 %s846_s24, 4  ;;  %s159_s25 = int_to_ptr.vmem [resolvable:$true] %s158_s25 }
   0xb   : > { %p529_p6 = scmp.ge.s32.totalorder %s844_s17, 2  ;;  %s847_s26 = smov 64  }
   0xc   : > { %p630_p4 = pneg %p909_p3  ;;  %s848_s27 = smov 4  }
   0xd   : > { %s525_s28 = sadd.s32 4294967294, %s844_s17   ;;  %s29_s29 = sadd.s32 1, %s840_s16 }
   0xe   : > { %p631_p5 = pnand %p630_p4, %p901_p1  ;;  %s39_s30 = sadd.s32 1, %s832_s14 }
   0xf   : > { %p30_p7 = scmp.ge.s32.totalorder %s29_s29, 2  ;;  %p46_p8 = scmp.ne.s32.totalorder %s832_s14, %s828_s13 }
  0x10   : > { %633 = dma.hbm_to_vmem [thread:$0]  (!%p631_p5), %s157_s22, 2048, %s159_s25, [#allocation6], %s847_s26, %s847_s26, %s848_s27  }
  0x11   : > { %p47_p9 = scmp.eq.s32.totalorder %s844_s17, 0  ;;  %p52_p10 = scmp.ne.s32.totalorder %s828_s13, %s824_s12 }
  0x12   : > { %s1036_s29 = smov (%p30_p7, %s29_s29), 0  ;;  %p130_p13 = scmp.eq.s32.totalorder %s524_s18, 1 }
  0x13   : > { %p928_p11 = por %p47_p9, %p46_p8  ;;  %p934_p12 = por %p901_p1, %p52_p10 }
  0x14   : > { %s36_s6 = ssub.s32 %s840_s16, %s1036_s29  ;;  %p136_p2 = scmp.eq.s32.totalorder %s525_s28, 1 }
  0x15   : > { %p37_p0 = scmp.eq.s32.totalorder %s36_s6, 0  ;;  %p940_p4 = por %p130_p13, %p46_p8 }
  0x16   : > { %p643_p5 = scmp.lt.s32.totalorder %s844_s17, 2  ;;  %p948_p7 = por %p136_p2, %p52_p10 }
  0x17   : > { %s946_s8 = scalar_select %p37_p0, %s832_s14, %s39_s30  }
  0x18   : > { %s178_s10 = sand.u32 1, %s832_s14   ;;  %s605_s20 = sshll.u32 %s840_s16, 4 }
  0x19   : > { %s530_s11 = sshll.u32 %s178_s10, 4  ;;  %s187_s18 = scalar_lea.hbm %s1020_s0, %s605_s20 }
  0x1a   : > { %s182_s24 = scalar_lea.vmem [#allocation2], %s530_s11  ;;  %s189_s26 = sshll.u32 %s187_s18, 4  ;;  %s190_s26 = int_to_ptr.hbm [resolvable:$true] %s189_s26 }
  0x1b   : > { %s191_s25 = sshll.u32 %s182_s24, 4  ;;  %p635_p8 = pnand %p643_p5, %p928_p11  ;;  %s192_s25 = int_to_ptr.vmem [resolvable:$true] %s191_s25 }
  0x1c   : > { %s179_s27 = scalar_lea.sflag [#allocation3], %s178_s10  ;;  %200 = sbr.rel (%p909_p3) target bundleno = 203 (0xcb), region = 32 }
  0x1d   : > { %637 = dma.hbm_to_vmem [thread:$0]  (!%p635_p8), %s190_s26, 256, %s192_s25, %s179_s27  }
  0x1e   : > { %s962_s28 = sand.u32 (!%p909_p3), 1, %s828_s13  }
  0x1f   : > { %s534_s30 = sshll.u32 (!%p909_p3), %s962_s28, 4  ;;  %s203_s6 = scalar_lea.sflag (!%p909_p3), [#allocation3], %s962_s28 }
  0x20   : > { %s966_s11 = scalar_lea.vmem (!%p909_p3), [#allocation2], %s534_s30 }
  0x21   : > { %811 = dma.done.wait (%p934_p12), %s203_s6, 256  }
  0x22   : > { %813 = vsyncadd (%p934_p12), %s203_s6, 4294967040 }
  0x23   : > { %815 = dma.done.wait (%p901_p1), [#allocation6], 2048  }
  0x24   : > { %817 = vsyncadd (%p901_p1), [#allocation6], 4294965248  ;;  %v613_v0 = vld [vmem:[#allocation5 + $0x38] sm:$0xff]  ;;  %v612_v2 = vld [vmem:[#allocation5 + $0x30] sm:$0xff]  ;;  %s536_s19 = sshll.u32 %s962_s28, 3  ;;  %s602_s23 = sshll.u32 %s836_s15, 3 }
  0x25   : > { %v621_v1 = vld [vmem:[#allocation5 + $0x78] sm:$0xff]  ;;  %377 = vmatpush.bf16.msra.mxu0 %v613_v0  ;;  %v620_v3 = vld [vmem:[#allocation5 + $0x70] sm:$0xff]  ;;  %v611_v4 = vld [vmem:[#allocation5 + $0x28] sm:$0xff]  ;;  %s416_s21 = scalar_lea.hbm %s1023_s3, %s602_s23  ;;  %s237_s22 = scalar_lea.vmem [#allocation7], %s536_s19 }
  0x26   : > { %390 = vmatpush.bf16.msra.mxu1 %v621_v1  ;;  %v619_v5 = vld [vmem:[#allocation5 + $0x68] sm:$0xff]  ;;  %v610_v6 = vld [vmem:[#allocation5 + $0x20] sm:$0xff]  ;;  %v609_v8 = vld [vmem:[#allocation5 + $0x18] sm:$0xff]  ;;  %s418_s18 = sshll.u32 %s237_s22, 4  ;;  %s420_s24 = sshll.u32 %s416_s21, 4  ;;  %s419_s18 = int_to_ptr.vmem [resolvable:$true] %s418_s18  ;;  %s421_s24 = int_to_ptr.hbm [resolvable:$true] %s420_s24 }
  0x27   : > { %v618_v7 = vld [vmem:[#allocation5 + $0x60] sm:$0xff]  ;;  %v617_v9 = vld [vmem:[#allocation5 + $0x58] sm:$0xff]  ;;  %v608_v10 = vld [vmem:[#allocation5 + $0x10] sm:$0xff]  ;;  %s405_s15 = scalar_lea.sflag [#allocation4], %s962_s28  ;;  %s772_s25 = sshra.s32 %s421_s24, 4  ;;  %s773_s25 = int_to_ptr.hbm [resolvable:$true] %s772_s25 }
  0x28   : > { %v616_v11 = vld [vmem:[#allocation5 + $0x50] sm:$0xff]  ;;  %v607_v12 = vld [vmem:[#allocation5 + $0x8] sm:$0xff]  ;;  %v606_v14 = vld [vmem:[#allocation5] sm:$0xff]  ;;  %s774_s26 = scalar_lea.hbm %s773_s25, 8  ;;  %s778_s6 = scalar_lea.hbm %s1023_s3, 16 }
  0x29   : > { %378 = vmatpush.bf16.msra.mxu0 %v612_v2  ;;  %v615_v13 = vld [vmem:[#allocation5 + $0x48] sm:$0xff]  ;;  %v614_v15 = vld [vmem:[#allocation5 + $0x40] sm:$0xff]  ;;  %p775_p1 = scmp.ne.s32.totalorder %s773_s25, %s774_s26  ;;  %p779_p10 = scmp.lt.s32.totalorder %s773_s25, %s1023_s3 }
  0x2a   : > { %391 = vmatpush.bf16.msra.mxu1 %v620_v3  ;;  %v241_v16 = vld [vmem:[%s966_s11] sm:$0xff]  ;;  %v242_v17 = vld [vmem:[%s966_s11 + $0x8] sm:$0xff]  ;;  %p780_p11 = scmp.lt.s32.totalorder %s778_s6, %s774_s26 }
  0x2b   : > { %v243_v18 = vpack.c.bf16 %v241_v16, %v241_v16  ;;  %v244_v19 = vpack.c.bf16 %v242_v17, %v242_v17  ;;  %v697_v20 = vld [vmem:[%s1022_s2] ss:$0 sm:$0xff]  ;;  %p776_p3 = pnand %p775_p1, %p940_p4 }
  0x2c   : > { %p781_p12 = por %p780_p11, %p779_p10 }
  0x2d   : > { %379 = vmatpush.bf16.msra.mxu0 %v611_v4  ;;  %p777_p9 = pneg %p776_p3 }
  0x2e   : > { %392 = vmatpush.bf16.msra.mxu1 %v619_v5 }
  0x2f   : > { %p782_p13 = pnand %p781_p12, %p777_p9 }
  0x31   : > { %380 = vmatpush.bf16.msra.mxu0 %v610_v6 }
  0x32   : > { %393 = vmatpush.bf16.msra.mxu1 %v618_v7 }
  0x35   : > { %381 = vmatpush.bf16.msra.mxu0 %v609_v8 }
  0x36   : > { %394 = vmatpush.bf16.msra.mxu1 %v617_v9 }
  0x39   : > { %382 = vmatpush.bf16.msra.mxu0 %v608_v10 }
  0x3a   : > { %395 = vmatpush.bf16.msra.mxu1 %v616_v11 }
  0x3d   : > { %383 = vmatpush.bf16.msra.mxu0 %v607_v12 }
  0x3e   : > { %396 = vmatpush.bf16.msra.mxu1 %v615_v13 }
  0x41   : > { %384 = vmatpush.bf16.msra.mxu0 %v606_v14 }
  0x42   : > { %397 = vmatpush.bf16.msra.mxu1 %v614_v15 }
  0x44   : > { %385 = vmatmul.bf16.vlgmr.msra.gmra.mxu0 %v243_v18 }
  0x45   : > { %398 = vmatmul.bf16.vlgmr.msra.gmra.mxu1 %v244_v19 }
  0xc1   : > { %v386_v21 = vpop.f32.mrf.mxu0 }
  0xc2   : > { %v399_v22 = vpop.f32.mrf.mxu1  ;;  %v387_v23 = vadd.f32 %v697_v20, %v386_v21 }
  0xc4   : > { %v400_v24 = vadd.f32 %v399_v22, %v387_v23 }
  0xc6   : > { %403 = vst [vmem:[%s237_s22] sm:$0xff] %v400_v24 }
  0xc7   : > { %785 = shalt.err (!%p782_p13)
}
  0xc8   : > { %628 = dma.vmem_to_hbm [thread:$0]  (%p940_p4), %s419_s18, 128, %s421_s24, %s405_s15  }
  0xc9   : > { %v388_v25 = vpop.f32.mrf.mxu0 }
  0xca   : > { %v401_v26 = vpop.f32.mrf.mxu1 }
  0xcb PF: > { %s432_s28 = sand.u32 1, %s824_s12   ;;  %p639_p0 = pnand %p529_p6, %p948_p7 }
  0xcc   : > { %s433_s23 = scalar_lea.sflag [#allocation4], %s432_s28 }
  0xcd   : > { %p640_p2 = pneg %p639_p0 }
  0xcf   : > { %819 = dma.done.wait (%p640_p2), %s433_s23, 128  }
  0xd0   : > { %821 = vsyncadd (%p640_p2), %s433_s23, 4294967168  ;;  %s20_s17 = sadd.s32 1, %s844_s17   ;;  %s1030_s12 = smov %s828_s13 }
  0xd1   : > { %p17_p5 = scmp.ge.s32.totalorder %s20_s17, 4   ;;  %s1031_s13 = smov %s832_s14 }
  0xd2   : > { %s1032_s14 = smov %s946_s8  ;;  %s1033_s15 = smov %s840_s16 }
  0xd3   : > { %s1034_s16 = smov %s1036_s29  ;;  %19 = sbr.rel (!%p17_p5) target bundleno = 7 (0x7), region = 85 }
  0xd8   :  { %439 = vsyncpa [#allocation3], 1 }
  0xd9   :  { %441 = vsyncpa [#allocation3 + $0x1], 1 }
  0xda   :  { %442 = vsyncpa [#allocation6], 1 }
  0xdb   :  { %443 = vsyncpa [#allocation4], 1 }
  0xdc   :  { %445 = vsyncpa [#allocation4 + $0x1], 1 }

</bundles_post_ra>
